<compile_context>
chip_gen: v5e
topology: v5e:2x2
jax: 0.10.0
libtpu: 0.0.40
codegen_flags: <defaults>
</compile_context>

<pallas_src>
import jax
import jax.numpy as jnp
from jax.experimental import pallas as pl
from jax.experimental.pallas import tpu as pltpu

EPS = 1e-12  # torch default eps for F.normalize


def l2_normalize_kernel(x_ref, o_ref):
    # One grid step owns a (tm, D) tile of rows; normalize each row along D.
    x = x_ref[...]
    xf = x.astype(jnp.float32)
    sumsq = jnp.sum(xf * xf, axis=-1, keepdims=True)            # (tm, 1) f32
    # clamp_min(eps) on the norm == clamp_min(eps^2) on sumsq (sqrt monotone).
    inv = jax.lax.rsqrt(jnp.maximum(sumsq, EPS * EPS))          # EUP, (tm, 1)
    if o_ref.dtype == jnp.float32:
        o_ref[...] = xf * inv                                   # f32 path
    else:
        # bf16/f16 path: scale in the input dtype, no full-tile f32 temp for
        # the output (v6e/v7x have bf16 VALU; ~1 ulp diff vs f32-then-cast).
        o_ref[...] = x * inv.astype(x.dtype)


def _vmem_budgets():
    """(tile_budget_bytes, scoped_vmem_limit_bytes), gated by chip generation."""
    phys = 64 << 20  # conservative fallback = v7x per-TC VMEM
    try:
        info = pltpu.get_tpu_info()
        phys = int(getattr(info, "vmem_capacity_bytes", phys))
    except Exception:
        pass
    if phys >= (128 << 20):      # v5e / v6e: 128 MiB physical VMEM
        return 24 << 20, 48 << 20
    else:                        # v7x: 64 MiB per TensorCore
        return 20 << 20, 40 << 20


def _pick_tm(N, D, itemsize, tile_budget):
    """Largest row tile fitting the double-buffered in+out tiles plus the f32
    intermediates in the tile budget, while keeping >=4 grid steps (v7x has
    2 TensorCores sharing the 'parallel' grid axis)."""
    TM_CAP = 16384               # let the VMEM budget, not this, usually decide
    MIN_GRID = 4

    # 2-deep buffered (in + out) tiles + one f32 tile (reduction temp) + f32 col.
    per_row = 2 * 2 * D * itemsize + D * 4 + 8
    tm = tile_budget // per_row
    tm = int(min(tm, TM_CAP, N))

    # If tile enlargement left too few grid steps (and N is big enough to split),
    # trade a smaller tm for >= MIN_GRID steps so megacore sharding has work.
    if N >= MIN_GRID * 16 and -(-N // tm) < MIN_GRID:
        tm = -(-N // MIN_GRID)

    # Sublane alignment (8 rows for 32-bit, 16 for 16-bit packing).
    sub = 8 if itemsize >= 4 else 16
    if tm >= sub:
        tm = (tm // sub) * sub
    else:
        tm = N  # tiny N: block == full array dim is always a legal block shape
    return max(tm, 1)


def normalize(x, use_pallas=None):
    """F.normalize(x, p=2, dim=1, eps=1e-12) for 2-D x, on TPU via Pallas."""
    # TODO(synk): only the 2-D (N, D) case is implemented; torch normalizes
    # dim=1 for higher-rank inputs, which would need a reshape/transpose wrapper.
    N, D = x.shape
    nbytes = N * D * x.dtype.itemsize

    if use_pallas is None:
        use_pallas = nbytes > (1 << 20)  # sub-MiB: launch overhead dominates

    if not use_pallas:
        # Small-input fast path: XLA fuses this trivially, no custom-call cost.
        xf = x.astype(jnp.float32)
        sumsq = jnp.sum(xf * xf, axis=1, keepdims=True)
        inv = jax.lax.rsqrt(jnp.maximum(sumsq, EPS * EPS))
        return (xf * inv).astype(x.dtype)

    tile_budget, vmem_limit = _vmem_budgets()
    tm = _pick_tm(N, D, x.dtype.itemsize, tile_budget)
    grid = (pl.cdiv(N, tm),)  # no divisibility requirement; last block is masked

    return pl.pallas_call(
        l2_normalize_kernel,
        out_shape=jax.ShapeDtypeStruct((N, D), x.dtype),
        grid_spec=pltpu.PrefetchScalarGridSpec(
            num_scalar_prefetch=0,
            grid=grid,
            # D kept whole in the block (reduction axis) and lane-dense.
            in_specs=[pl.BlockSpec((tm, D), lambda i: (i, 0))],
            out_specs=pl.BlockSpec((tm, D), lambda i: (i, 0)),
        ),
        compiler_params=pltpu.CompilerParams(
            dimension_semantics=("parallel",),
            vmem_limit_bytes=vmem_limit,
        ),
    )(x)


def _ref(x):
    xf = x.astype(jnp.float32)
    n = jnp.maximum(jnp.linalg.norm(xf, axis=1, keepdims=True), EPS)
    return (xf / n).astype(x.dtype)


if __name__ == "__main__":
    key = jax.random.PRNGKey(0)

    # Small feature-vector batch consistent with the module: batch=16, hidden=128.
    # Force the pallas path so the kernel itself is exercised.
    x = jax.random.normal(key, (16, 128), dtype=jnp.float32)
    out = jax.block_until_ready(normalize(x, use_pallas=True))
    assert jnp.allclose(out, _ref(x), atol=1e-5, rtol=1e-5), "mismatch vs reference"

    # Non-divisible row count (cdiv grid + masked last block) and an all-zero
    # row (exercises the eps clamp, matching torch semantics).
    x2 = jax.random.normal(jax.random.PRNGKey(1), (20, 128), dtype=jnp.float32)
    x2 = x2.at[0].set(0.0)
    out2 = jax.block_until_ready(normalize(x2, use_pallas=True))
    assert jnp.allclose(out2, _ref(x2), atol=1e-5, rtol=1e-5), "mismatch vs reference (ragged)"

    # bf16 path (f32 sum-of-squares, scale in bf16) — looser tolerance.
    x3 = jax.random.normal(jax.random.PRNGKey(2), (64, 128), dtype=jnp.bfloat16)
    out3 = jax.block_until_ready(normalize(x3, use_pallas=True))
    assert jnp.allclose(out3.astype(jnp.float32), _ref(x3).astype(jnp.float32),
                        atol=2e-2, rtol=2e-2), "mismatch vs reference (bf16)"

    # Auto path: small input takes the plain-JAX fast path, same semantics.
    out4 = jax.block_until_ready(normalize(x))
    assert jnp.allclose(out4, _ref(x), atol=1e-5, rtol=1e-5), "mismatch vs reference (fast path)"

    print("KERNEL_OK")
</pallas_src>

<mosaic_0001>
module attributes {stable_mosaic.version = 11 : i64} {
  func.func @l2_normalize_kernel(%arg0: i32, %arg1: memref<16x128xf32, #tpu.memory_space<vmem>>, %arg2: memref<16x128xf32, #tpu.memory_space<vmem>>) attributes {dimension_semantics = [#tpu.dimension_semantics<parallel>], iteration_bounds = array<i64: 1>, scalar_prefetch = 0 : i64, scratch_operands = 0 : i64, tpu.core_type = #tpu.core_type<tc>, window_params = [{transform_indices = @transform_0, window_bounds = array<i64: 16, 128>}, {transform_indices = @transform_1, window_bounds = array<i64: 16, 128>}]} {
    %c0 = arith.constant 0 : index
    %c0_0 = arith.constant 0 : index
    %0 = vector.load %arg1[%c0, %c0_0] : memref<16x128xf32, #tpu.memory_space<vmem>>, vector<16x128xf32>
    %1 = arith.mulf %0, %0 : vector<16x128xf32>
    %cst = arith.constant dense<0.000000e+00> : vector<16xf32>
    %2 = vector.multi_reduction <add>, %1, %cst [1] : vector<16x128xf32> to vector<16xf32>
    %3 = vector.shape_cast %2 : vector<16xf32> to vector<16x1xf32>
    %cst_1 = arith.constant 1.000000e-24 : f32
    %4 = vector.broadcast %cst_1 : f32 to vector<16x1xf32>
    %5 = arith.maximumf %3, %4 : vector<16x1xf32>
    %6 = math.rsqrt %5 : vector<16x1xf32>
    %7 = vector.broadcast %6 : vector<16x1xf32> to vector<16x128xf32>
    %8 = arith.mulf %0, %7 : vector<16x128xf32>
    %c0_2 = arith.constant 0 : index
    %c0_3 = arith.constant 0 : index
    %9 = vector.load %arg2[%c0_2, %c0_3] : memref<16x128xf32, #tpu.memory_space<vmem>>, vector<16x128xf32>
    tpu.vector_store %arg2[%c0_2, %c0_3], %8 {strides = array<i32>} : memref<16x128xf32, #tpu.memory_space<vmem>>, vector<16x128xf32>,
    return
  }
  func.func @transform_0(%arg0: i32) -> (i32, i32) {
    %c0_i32 = arith.constant 0 : i32
    %c0_i32_0 = arith.constant 0 : i32
    return %arg0, %c0_i32 : i32, i32
  }
  func.func @transform_1(%arg0: i32) -> (i32, i32) {
    %c0_i32 = arith.constant 0 : i32
    %c0_i32_0 = arith.constant 0 : i32
    return %arg0, %c0_i32 : i32, i32
  }
}

</mosaic_0001>

<bundles_post_ra>
// kernel: tpu_custom_call.1
= control target key start
LH: loop header
LB: loop body
LE: loop exit
PB: predicated region body
PF: predicated region fallthrough
CT: control target
= control target key end

     0   :  { %6 = vsyncpa [#allocation3], 0  ;;  %s164_s0 = inlined_call_operand.hbm [shape: f32[16,128], index: 0, kind: input, shape index: {}]   ;;  %s165_s1 = inlined_call_operand.hbm [shape: f32[16,128], index: 1, kind: output, shape index: {}]  }
   0x1   :  { %7 = vsyncpa [#allocation4], 0  ;;  %s12_s8 = sshll.u32 %s164_s0, 4  ;;  %s138_s9 = smov [#allocation2]   ;;  %s13_s8 = int_to_ptr.hbm [resolvable:$true] %s12_s8 }
   0x2   :  { %s14_s10 = sshll.u32 %s138_s9, 4  ;;  %s139_s11 = smov 128   ;;  %s15_s10 = int_to_ptr.vmem [resolvable:$true] %s14_s10 }
   0x3   :  { %s140_s12 = smov 8  }
   0x4   :  { %20 = dma.hbm_to_vmem [thread:$0]  %s13_s8, 256, %s15_s10, [#allocation3], %s139_s11, %s139_s11, %s140_s12  }
   0x5   :  { %134 = dma.done.wait [#allocation3], 256  }
   0x6   :  { %135 = vsyncadd [#allocation3], 4294967040  ;;  %v25_v0 = vld [vmem:[#allocation2] sm:$0xff]  ;;  %v26_v2 = vld [vmem:[#allocation2 + $0x8] sm:$0xff]  ;;  %s141_s0 = smov [#allocation5]   ;;  %s65_s16 = sshll.u32 %s165_s1, 4  ;;  %s66_s16 = int_to_ptr.hbm [resolvable:$true] %s65_s16 }
   0x7   :  { %v27_v1 = vmul.f32 %v25_v0, %v25_v0  ;;  %v28_v3 = vmul.f32 %v26_v2, %v26_v2  ;;  %s63_s13 = sshll.u32 %s141_s0, 4  ;;  %s64_s13 = int_to_ptr.vmem [resolvable:$true] %s63_s13 }
   0x9   :  { %29 = vadd.xlane.f32.xlu0 %v27_v1 }
  0x11   :  { %31 = vadd.xlane.f32.xlu0 %v28_v3 }
  0x7c   :  { %v30_v4 = vpop.xlane.xlu0 %29 }
  0x7d   :  { %v33_v5 = vmax.f32 %v30_v4, 1e-24 }
  0x7f   :  { %82 = vrsqrt.f32 %v33_v5  ;;  %vm41_vm1 = vweird.f32 %v33_v5 }
  0x84   :  { %v32_v6 = vpop.xlane.xlu0 %31 }
  0x85   :  { %v83_v7 = vpop.eup %82  ;;  %v34_v8 = vmax.f32 %v32_v6, 1e-24 }
  0x86   :  { %v36_v9 = vmul.f32 %v83_v7, %v33_v5  ;;  %vm42_vm0 = vweird.f32 %v83_v7 }
  0x87   :  { %84 = vrsqrt.f32 %v34_v8  ;;  %vm43_vm2 = vmor %vm41_vm1, %vm42_vm0  ;;  %vm51_vm4 = vweird.f32 %v34_v8 }
  0x88   :  { %v37_v10 = vmul.f32 %v83_v7, %v36_v9 }
  0x8a   :  { %v38_v11 = vmul.f32 0.5, %v37_v10 }
  0x8c   :  { %v39_v12 = vsub.f32 1.5, %v38_v11 }
  0x8d   :  { %v85_v13 = vpop.eup %84 }
  0x8e   :  { %v40_v14 = vmul.f32 %v83_v7, %v39_v12  ;;  %v46_v15 = vmul.f32 %v85_v13, %v34_v8  ;;  %vm52_vm3 = vweird.f32 %v85_v13 }
  0x8f   :  { %vm53_vm5 = vmor %vm51_vm4, %vm52_vm3 }
  0x90   :  { %v44_v16 = vsel %vm43_vm2, %v83_v7, %v40_v14  ;;  %v47_v17 = vmul.f32 %v85_v13, %v46_v15 }
  0x91   :  { %v55_v18 = vmul.f32 %v44_v16, %v25_v0 }
  0x92   :  { %v48_v19 = vmul.f32 0.5, %v47_v17 }
  0x93   :  { %57 = vst [vmem:[#allocation5] sm:$0xff] %v55_v18 }
  0x94   :  { %v49_v20 = vsub.f32 1.5, %v48_v19 }
  0x96   :  { %v50_v21 = vmul.f32 %v85_v13, %v49_v20 }
  0x98   :  { %v54_v22 = vsel %vm53_vm5, %v85_v13, %v50_v21 }
  0x99   :  { %v56_v23 = vmul.f32 %v54_v22, %v26_v2 }
  0x9b   :  { %58 = vst [vmem:[#allocation5 + $0x8] sm:$0xff] %v56_v23 }
  0x9c   :  { %71 = dma.vmem_to_hbm [thread:$0]  %s64_s13, 256, %s66_s16, [#allocation4], %s139_s11, %s139_s11, %s140_s12  }
  0x9d   :  { %136 = dma.done.wait [#allocation4], 256  }
  0x9e   :  { %137 = vsyncadd [#allocation4], 4294967040 }
  0x9f   :  { %76 = vsyncpa [#allocation3], 1 }
  0xa0   :  { %77 = vsyncpa [#allocation4], 1 }

</bundles_post_ra>
